<compile_context>
chip_gen: v7x
topology: tpu7x:2x2x1
jax: 0.10.0
libtpu: 0.0.40
codegen_flags: <defaults>
</compile_context>

<pallas_src>
import jax
import jax.numpy as jnp
from jax.experimental import pallas as pl
from jax.experimental.pallas import tpu as pltpu

NEG_INF = -1000000000.0


def _attention_kernel(bias_ref, q_ref, k_ref, v_ref, o_ref, p_ref):
    """One grid step: BB batch elements x TT target rows, full source length S.

    bias_ref : (BB, 1, S)  f32, additive mask bias (0 = valid, NEG_INF = masked)
    q_ref    : (BB, TT, H)
    k_ref    : (BB, S,  H)
    v_ref    : (BB, S,  M)
    o_ref    : (BB, TT, M)  combination of values and attention probabilities
    p_ref    : (BB, TT, S)  attention probabilities
    """
    q = q_ref[...]
    k = k_ref[...]
    v = v_ref[...]

    # 1. scorer (dot product): transpose-free NT contraction on the MXU with
    #    f32 accumulation (Mosaic keeps full input precision for f32 operands).
    scores = jnp.einsum('bqd,bkd->bqk', q, k,
                        preferred_element_type=jnp.float32)   # (BB, TT, S)

    # 2. masked_fill(mask == 0, NEG_INF) as a single additive bias.
    scores = scores + bias_ref[...]

    # 3. numerically-stable softmax over the source axis.  Exact per-row
    #    reciprocal: approx=True was ~2^-8 accurate and is NOT used because
    #    p_attn is an output consumed downstream.
    smax = jnp.max(scores, axis=-1, keepdims=True)
    e = jnp.exp(scores - smax)
    denom = jnp.sum(e, axis=-1, keepdims=True)
    p_attn = e * (1.0 / denom)

    # dropout(p=0.0) is the identity.
    # TODO(synk): nonzero dropout would use pltpu.prng_seed / prng_random_bits.

    # 4. o_attn = einsum('bts,bsm->btm', p_attn, values), f32 accumulation.
    o_attn = jnp.einsum('bqk,bkd->bqd', p_attn.astype(v.dtype), v,
                        preferred_element_type=jnp.float32)

    o_ref[...] = o_attn.astype(o_ref.dtype)
    p_ref[...] = p_attn.astype(p_ref.dtype)


def _vmem_capacity_bytes():
    """Physical per-core VMEM; conservative 64 MiB (v7x) fallback."""
    try:
        cap = getattr(pltpu.get_tpu_info(), "vmem_capacity_bytes", None)
        if cap:
            return int(cap)
    except Exception:
        pass
    return 64 * 1024 * 1024


def _round_down_mult(x, m):
    return max(m, (x // m) * m)


def _choose_tiles(B, T, S, H, M, block_b, block_t, in_bytes, p_bytes, budget):
    """Pick (BB, TT) so the per-step working set fits the VMEM budget.

    K/V/bias HBM traffic is independent of BB (their blocks are resident
    across the inner target axis), so BB only multiplies VMEM residency:
    keep it small (default 1) and spend the budget on the target tile.
    """
    BB = max(1, min(block_b, B))
    while B % BB:                      # never pad the batch: padding K/V is a
        BB -= 1                        # full HBM round trip before the kernel

    TT = T if T <= block_t else _round_down_mult(block_t, 8)

    def usage(bb, tt):
        q_o = 2 * bb * tt * (H + M) * in_bytes          # q + o, double buffered
        p_o = 2 * bb * tt * S * p_bytes                 # p, double buffered
        kv = bb * S * (H * in_bytes + M * in_bytes + 4)  # k + v + bias, 1 buffer
        tmp = 2 * bb * tt * S * 4                       # scores / exp temps
        return 2 * q_o // 2 + q_o + p_o + kv + tmp      # q_o counted twice (in+out)

    while usage(BB, TT) > budget and TT > 8:
        TT = _round_down_mult(TT // 2, 8)
    while usage(BB, TT) > budget and BB > 1:
        BB -= 1
        while B % BB:
            BB -= 1

    # v7x shards "parallel" grid axes across its 2 TensorCores: make sure
    # small workloads still produce >= 2 grid steps when possible.
    if (B // BB) * pl.cdiv(T, TT) < 2 and TT > 8:
        TT = _round_down_mult(TT // 2, 8)

    # Prefer a TT that divides T (avoids padding the query); otherwise pad q.
    if T % TT:
        for cand in range(_round_down_mult(TT, 8), max(8, TT // 2) - 1, -8):
            if T % cand == 0:
                TT = cand
                break
    return BB, TT


def attention(query, keys, values=None, mask=None, *,
              block_b=1, block_t=512,
              p_dtype=jnp.float32, compute_dtype=None):
    """Pallas equivalent of Attention.forward (dot-product scorer, dropout=0).

    query : (B, T, H);  keys : (B, S, H);  values : (B, S, M) or None (= keys)
    mask  : (B, S) or None (all valid); nonzero = valid source position.
    p_dtype       : dtype of returned probabilities (bf16 halves p writeback).
    compute_dtype : optional q/k/v cast for the MXU (bf16 recommended on
                    v5e/v6e/v7x); accumulation stays f32.

    Returns (o_attn[B, T, M], p_attn[B, T, S]).
    """
    if values is None:
        values = keys
    B, T, H = query.shape
    _, S, _ = keys.shape
    M = values.shape[-1]
    out_dtype = query.dtype

    # masked_fill(mask == 0, NEG_INF) as an additive bias, shaped (B, 1, S) so
    # the block's trailing two dims always equal the full array dims.
    if mask is None:
        bias = jnp.zeros((B, 1, S), dtype=jnp.float32)
    else:
        bias = jnp.where(mask == 0, jnp.float32(NEG_INF),
                         jnp.float32(0.0)).reshape(B, 1, S)

    if compute_dtype is not None:
        query = query.astype(compute_dtype)
        keys = keys.astype(compute_dtype)
        values = values.astype(compute_dtype)

    in_bytes = jnp.dtype(query.dtype).itemsize
    p_bytes = jnp.dtype(p_dtype).itemsize

    vmem_cap = _vmem_capacity_bytes()
    vmem_budget = int(vmem_cap * 0.6)        # headroom for compiler scratch
    vmem_limit = int(vmem_cap * 0.85)        # raise the default scoped limit

    BB, TT = _choose_tiles(B, T, S, H, M, block_b, block_t,
                           in_bytes, p_bytes, vmem_budget)

    # Only the query (and outputs) are ever padded, along T; K/V/mask never.
    Tp = pl.cdiv(T, TT) * TT
    q = query if Tp == T else jnp.pad(query, ((0, 0), (0, Tp - T), (0, 0)))

    grid = (B // BB, Tp // TT)

    cost = pl.CostEstimate(
        flops=2 * B * Tp * S * (H + M),                      # QK^T + PV
        transcendentals=B * Tp * S,                          # exp
        bytes_accessed=(q.size + keys.size + values.size) * in_bytes
        + bias.size * 4
        + B * Tp * M * jnp.dtype(out_dtype).itemsize         # o_attn
        + B * Tp * S * p_bytes,                              # p_attn
    )

    def build(single_buffer_kv):
        def resident(shape, imap):
            # K/V/bias keep the same block across the inner (target) axis; a
            # second pipeline buffer only doubles the largest VMEM consumers
            # to hide a DMA that fires once every T/TT steps.
            if single_buffer_kv:
                return pl.BlockSpec(shape, imap, pipeline_mode=pl.Buffered(1))
            return pl.BlockSpec(shape, imap)

        grid_spec = pltpu.PrefetchScalarGridSpec(
            num_scalar_prefetch=0,
            grid=grid,
            in_specs=[
                resident((BB, 1, S), lambda b, t: (b, 0, 0)),        # bias
                pl.BlockSpec((BB, TT, H), lambda b, t: (b, t, 0)),   # query
                resident((BB, S, H), lambda b, t: (b, 0, 0)),        # keys
                resident((BB, S, M), lambda b, t: (b, 0, 0)),        # values
            ],
            out_specs=[
                pl.BlockSpec((BB, TT, M), lambda b, t: (b, t, 0)),   # o_attn
                pl.BlockSpec((BB, TT, S), lambda b, t: (b, t, 0)),   # p_attn
            ],
        )
        return pl.pallas_call(
            _attention_kernel,
            grid_spec=grid_spec,
            out_shape=(
                jax.ShapeDtypeStruct((B, Tp, M), out_dtype),
                jax.ShapeDtypeStruct((B, Tp, S), p_dtype),
            ),
            compiler_params=pltpu.CompilerParams(
                dimension_semantics=("parallel", "parallel"),
                vmem_limit_bytes=vmem_limit),
            cost_estimate=cost,
        )

    single_buffer = hasattr(pl, "Buffered")
    try:
        o, p = build(single_buffer)(bias, q, keys, values)
    except Exception:
        if not single_buffer:
            raise
        o, p = build(False)(bias, q, keys, values)   # default double-buffering

    if Tp != T:
        o = o[:, :T]
        p = p[:, :T]
    return o, p


def _reference(query, keys, values=None, mask=None):
    """Pure-JAX reference mirroring the PyTorch forward (f32, full precision)."""
    if values is None:
        values = keys
    scores = jnp.einsum('bth,bsh->bts', query, keys,
                        precision=jax.lax.Precision.HIGHEST).astype(jnp.float32)
    if mask is not None:
        scores = jnp.where(mask[:, None, :] == 0, NEG_INF, scores)
    p_attn = jax.nn.softmax(scores, axis=-1)
    o_attn = jnp.einsum('bts,bsm->btm', p_attn.astype(values.dtype), values,
                        precision=jax.lax.Precision.HIGHEST)
    return o_attn, p_attn


if __name__ == "__main__":
    key = jax.random.PRNGKey(0)
    B, T, S, H = 2, 8, 8, 32

    kq, kk, kv = jax.random.split(key, 3)
    query = jax.random.normal(kq, (B, T, H), dtype=jnp.float32)
    keys = jax.random.normal(kk, (B, S, H), dtype=jnp.float32)
    values = jax.random.normal(kv, (B, S, H), dtype=jnp.float32)
    # deterministic mask: last two source positions of batch 1 are invalid
    mask = jnp.ones((B, S), dtype=jnp.float32).at[1, S - 2:].set(0.0)

    o_attn, p_attn = attention(query, keys, values, mask)
    jax.block_until_ready((o_attn, p_attn))

    o_ref, p_ref = _reference(query, keys, values, mask)
    assert o_attn.shape == (B, T, H) and p_attn.shape == (B, T, S)
    # Exact softmax divide + f32 MXU accumulation: only ~1e-6-level residue.
    assert jnp.allclose(o_attn, o_ref, atol=1e-3, rtol=1e-3), (
        float(jnp.max(jnp.abs(o_attn - o_ref))))
    assert jnp.allclose(p_attn, p_ref, atol=1e-3, rtol=1e-3), (
        float(jnp.max(jnp.abs(p_attn - p_ref))))

    print("KERNEL_OK")
</pallas_src>

<mosaic_0001>
module attributes {stable_mosaic.version = 11 : i64} {
  func.func @_attention_kernel(%arg0: i32, %arg1: i32, %arg2: memref<1x1x8xf32, #tpu.memory_space<vmem>>, %arg3: memref<1x8x32xf32, #tpu.memory_space<vmem>>, %arg4: memref<1x8x32xf32, #tpu.memory_space<vmem>>, %arg5: memref<1x8x32xf32, #tpu.memory_space<vmem>>, %arg6: memref<1x8x32xf32, #tpu.memory_space<vmem>>, %arg7: memref<1x8x8xf32, #tpu.memory_space<vmem>>) attributes {dimension_semantics = [#tpu.dimension_semantics<parallel>, #tpu.dimension_semantics<parallel>], iteration_bounds = array<i64: 2, 1>, scalar_prefetch = 0 : i64, scratch_operands = 0 : i64, tpu.core_type = #tpu.core_type<tc>, window_params = [{pipeline_mode = #tpu.pipeline_mode<synchronous>, transform_indices = @transform_0, window_bounds = array<i64: 1, 1, 8>}, {transform_indices = @transform_1, window_bounds = array<i64: 1, 8, 32>}, {pipeline_mode = #tpu.pipeline_mode<synchronous>, transform_indices = @transform_2, window_bounds = array<i64: 1, 8, 32>}, {pipeline_mode = #tpu.pipeline_mode<synchronous>, transform_indices = @transform_3, window_bounds = array<i64: 1, 8, 32>}, {transform_indices = @transform_4, window_bounds = array<i64: 1, 8, 32>}, {transform_indices = @transform_5, window_bounds = array<i64: 1, 8, 8>}]} {
    %c0 = arith.constant 0 : index
    %c0_0 = arith.constant 0 : index
    %c0_1 = arith.constant 0 : index
    %0 = vector.load %arg3[%c0, %c0_0, %c0_1] : memref<1x8x32xf32, #tpu.memory_space<vmem>>, vector<1x8x32xf32>
    %c0_2 = arith.constant 0 : index
    %c0_3 = arith.constant 0 : index
    %c0_4 = arith.constant 0 : index
    %1 = vector.load %arg4[%c0_2, %c0_3, %c0_4] : memref<1x8x32xf32, #tpu.memory_space<vmem>>, vector<1x8x32xf32>
    %c0_5 = arith.constant 0 : index
    %c0_6 = arith.constant 0 : index
    %c0_7 = arith.constant 0 : index
    %2 = vector.load %arg5[%c0_5, %c0_6, %c0_7] : memref<1x8x32xf32, #tpu.memory_space<vmem>>, vector<1x8x32xf32>
    "tpu.trace_start"() <{level = 10 : i32, message = "bqd,bkd->bqk"}> : () -> ()
    %cst = arith.constant dense<0.000000e+00> : vector<1x8x8xf32>
    %3 = tpu.matmul %0, %1, %cst {dimension_numbers = #tpu.dot_dimension_numbers<[2], [2], [1], [1], [0, 0, 0, 1, 1, 1], [0], [0]>} : vector<1x8x32xf32>, vector<1x8x32xf32>, vector<1x8x8xf32> -> vector<1x8x8xf32>
    "tpu.trace_stop"() : () -> ()
    %c0_8 = arith.constant 0 : index
    %c0_9 = arith.constant 0 : index
    %c0_10 = arith.constant 0 : index
    %4 = vector.load %arg2[%c0_8, %c0_9, %c0_10] : memref<1x1x8xf32, #tpu.memory_space<vmem>>, vector<1x1x8xf32>
    %5 = vector.broadcast %4 : vector<1x1x8xf32> to vector<1x8x8xf32>
    %6 = arith.addf %3, %5 : vector<1x8x8xf32>
    %cst_11 = arith.constant dense<0xFF800000> : vector<1x8xf32>
    %7 = vector.multi_reduction <maximumf>, %6, %cst_11 [2] : vector<1x8x8xf32> to vector<1x8xf32>
    %8 = vector.shape_cast %7 : vector<1x8xf32> to vector<1x8x1xf32>
    %9 = vector.broadcast %8 : vector<1x8x1xf32> to vector<1x8x8xf32>
    %10 = arith.subf %6, %9 : vector<1x8x8xf32>
    %11 = math.exp %10 : vector<1x8x8xf32>
    %cst_12 = arith.constant dense<0.000000e+00> : vector<1x8xf32>
    %12 = vector.multi_reduction <add>, %11, %cst_12 [2] : vector<1x8x8xf32> to vector<1x8xf32>
    %13 = vector.shape_cast %12 : vector<1x8xf32> to vector<1x8x1xf32>
    %cst_13 = arith.constant 1.000000e+00 : f32
    %14 = vector.broadcast %cst_13 : f32 to vector<1x8x1xf32>
    %15 = arith.divf %14, %13 : vector<1x8x1xf32>
    %16 = vector.broadcast %15 : vector<1x8x1xf32> to vector<1x8x8xf32>
    %17 = arith.mulf %11, %16 : vector<1x8x8xf32>
    "tpu.trace_start"() <{level = 10 : i32, message = "bqk,bkd->bqd"}> : () -> ()
    %cst_14 = arith.constant dense<0.000000e+00> : vector<1x8x32xf32>
    %18 = tpu.matmul %17, %2, %cst_14 {dimension_numbers = #tpu.dot_dimension_numbers<[2], [1], [1], [2], [0, 0, 0, 1, 1, 2], [0], [0]>} : vector<1x8x8xf32>, vector<1x8x32xf32>, vector<1x8x32xf32> -> vector<1x8x32xf32>
    "tpu.trace_stop"() : () -> ()
    %c0_15 = arith.constant 0 : index
    %c0_16 = arith.constant 0 : index
    %c0_17 = arith.constant 0 : index
    %19 = vector.load %arg6[%c0_15, %c0_16, %c0_17] : memref<1x8x32xf32, #tpu.memory_space<vmem>>, vector<1x8x32xf32>
    tpu.vector_store %arg6[%c0_15, %c0_16, %c0_17], %18 {strides = array<i32>} : memref<1x8x32xf32, #tpu.memory_space<vmem>>, vector<1x8x32xf32>,
    %c0_18 = arith.constant 0 : index
    %c0_19 = arith.constant 0 : index
    %c0_20 = arith.constant 0 : index
    %20 = vector.load %arg7[%c0_18, %c0_19, %c0_20] : memref<1x8x8xf32, #tpu.memory_space<vmem>>, vector<1x8x8xf32>
    tpu.vector_store %arg7[%c0_18, %c0_19, %c0_20], %17 {strides = array<i32>} : memref<1x8x8xf32, #tpu.memory_space<vmem>>, vector<1x8x8xf32>,
    return
  }
  func.func @transform_0(%arg0: i32, %arg1: i32) -> (i32, i32, i32) {
    %c0_i32 = arith.constant 0 : i32
    %c0_i32_0 = arith.constant 0 : i32
    %c0_i32_1 = arith.constant 0 : i32
    return %arg0, %c0_i32, %c0_i32_0 : i32, i32, i32
  }
  func.func @transform_1(%arg0: i32, %arg1: i32) -> (i32, i32, i32) {
    %c0_i32 = arith.constant 0 : i32
    %c0_i32_0 = arith.constant 0 : i32
    return %arg0, %arg1, %c0_i32 : i32, i32, i32
  }
  func.func @transform_2(%arg0: i32, %arg1: i32) -> (i32, i32, i32) {
    %c0_i32 = arith.constant 0 : i32
    %c0_i32_0 = arith.constant 0 : i32
    %c0_i32_1 = arith.constant 0 : i32
    return %arg0, %c0_i32, %c0_i32_0 : i32, i32, i32
  }
  func.func @transform_3(%arg0: i32, %arg1: i32) -> (i32, i32, i32) {
    %c0_i32 = arith.constant 0 : i32
    %c0_i32_0 = arith.constant 0 : i32
    %c0_i32_1 = arith.constant 0 : i32
    return %arg0, %c0_i32, %c0_i32_0 : i32, i32, i32
  }
  func.func @transform_4(%arg0: i32, %arg1: i32) -> (i32, i32, i32) {
    %c0_i32 = arith.constant 0 : i32
    %c0_i32_0 = arith.constant 0 : i32
    return %arg0, %arg1, %c0_i32 : i32, i32, i32
  }
  func.func @transform_5(%arg0: i32, %arg1: i32) -> (i32, i32, i32) {
    %c0_i32 = arith.constant 0 : i32
    %c0_i32_0 = arith.constant 0 : i32
    return %arg0, %arg1, %c0_i32 : i32, i32, i32
  }
}

module attributes {stable_mosaic.version = 11 : i64} {
  func.func @_attention_kernel(%arg0: i32, %arg1: i32, %arg2: memref<1x1x8xf32, #tpu.memory_space<vmem>>, %arg3: memref<1x8x32xf32, #tpu.memory_space<vmem>>, %arg4: memref<1x8x32xf32, #tpu.memory_space<vmem>>, %arg5: memref<1x8x32xf32, #tpu.memory_space<vmem>>, %arg6: memref<1x8x32xf32, #tpu.memory_space<vmem>>, %arg7: memref<1x8x8xf32, #tpu.memory_space<vmem>>) attributes {dimension_semantics = [#tpu.dimension_semantics<parallel>, #tpu.dimension_semantics<parallel>], iteration_bounds = array<i64: 2, 1>, scalar_prefetch = 0 : i64, scratch_operands = 0 : i64, tpu.core_type = #tpu.core_type<tc>, window_params = [{transform_indices = @transform_0, window_bounds = array<i64: 1, 1, 8>}, {transform_indices = @transform_1, window_bounds = array<i64: 1, 8, 32>}, {transform_indices = @transform_2, window_bounds = array<i64: 1, 8, 32>}, {transform_indices = @transform_3, window_bounds = array<i64: 1, 8, 32>}, {transform_indices = @transform_4, window_bounds = array<i64: 1, 8, 32>}, {transform_indices = @transform_5, window_bounds = array<i64: 1, 8, 8>}]} {
    %c0 = arith.constant 0 : index
    %c0_0 = arith.constant 0 : index
    %c0_1 = arith.constant 0 : index
    %0 = vector.load %arg3[%c0, %c0_0, %c0_1] : memref<1x8x32xf32, #tpu.memory_space<vmem>>, vector<1x8x32xf32>
    %c0_2 = arith.constant 0 : index
    %c0_3 = arith.constant 0 : index
    %c0_4 = arith.constant 0 : index
    %1 = vector.load %arg4[%c0_2, %c0_3, %c0_4] : memref<1x8x32xf32, #tpu.memory_space<vmem>>, vector<1x8x32xf32>
    %c0_5 = arith.constant 0 : index
    %c0_6 = arith.constant 0 : index
    %c0_7 = arith.constant 0 : index
    %2 = vector.load %arg5[%c0_5, %c0_6, %c0_7] : memref<1x8x32xf32, #tpu.memory_space<vmem>>, vector<1x8x32xf32>
    "tpu.trace_start"() <{level = 10 : i32, message = "bqd,bkd->bqk"}> : () -> ()
    %cst = arith.constant dense<0.000000e+00> : vector<1x8x8xf32>
    %3 = tpu.matmul %0, %1, %cst {dimension_numbers = #tpu.dot_dimension_numbers<[2], [2], [1], [1], [0, 0, 0, 1, 1, 1], [0], [0]>} : vector<1x8x32xf32>, vector<1x8x32xf32>, vector<1x8x8xf32> -> vector<1x8x8xf32>
    "tpu.trace_stop"() : () -> ()
    %c0_8 = arith.constant 0 : index
    %c0_9 = arith.constant 0 : index
    %c0_10 = arith.constant 0 : index
    %4 = vector.load %arg2[%c0_8, %c0_9, %c0_10] : memref<1x1x8xf32, #tpu.memory_space<vmem>>, vector<1x1x8xf32>
    %5 = vector.broadcast %4 : vector<1x1x8xf32> to vector<1x8x8xf32>
    %6 = arith.addf %3, %5 : vector<1x8x8xf32>
    %cst_11 = arith.constant dense<0xFF800000> : vector<1x8xf32>
    %7 = vector.multi_reduction <maximumf>, %6, %cst_11 [2] : vector<1x8x8xf32> to vector<1x8xf32>
    %8 = vector.shape_cast %7 : vector<1x8xf32> to vector<1x8x1xf32>
    %9 = vector.broadcast %8 : vector<1x8x1xf32> to vector<1x8x8xf32>
    %10 = arith.subf %6, %9 : vector<1x8x8xf32>
    %11 = math.exp %10 : vector<1x8x8xf32>
    %cst_12 = arith.constant dense<0.000000e+00> : vector<1x8xf32>
    %12 = vector.multi_reduction <add>, %11, %cst_12 [2] : vector<1x8x8xf32> to vector<1x8xf32>
    %13 = vector.shape_cast %12 : vector<1x8xf32> to vector<1x8x1xf32>
    %cst_13 = arith.constant 1.000000e+00 : f32
    %14 = vector.broadcast %cst_13 : f32 to vector<1x8x1xf32>
    %15 = arith.divf %14, %13 : vector<1x8x1xf32>
    %16 = vector.broadcast %15 : vector<1x8x1xf32> to vector<1x8x8xf32>
    %17 = arith.mulf %11, %16 : vector<1x8x8xf32>
    "tpu.trace_start"() <{level = 10 : i32, message = "bqk,bkd->bqd"}> : () -> ()
    %cst_14 = arith.constant dense<0.000000e+00> : vector<1x8x32xf32>
    %18 = tpu.matmul %17, %2, %cst_14 {dimension_numbers = #tpu.dot_dimension_numbers<[2], [1], [1], [2], [0, 0, 0, 1, 1, 2], [0], [0]>} : vector<1x8x8xf32>, vector<1x8x32xf32>, vector<1x8x32xf32> -> vector<1x8x32xf32>
    "tpu.trace_stop"() : () -> ()
    %c0_15 = arith.constant 0 : index
    %c0_16 = arith.constant 0 : index
    %c0_17 = arith.constant 0 : index
    %19 = vector.load %arg6[%c0_15, %c0_16, %c0_17] : memref<1x8x32xf32, #tpu.memory_space<vmem>>, vector<1x8x32xf32>
    tpu.vector_store %arg6[%c0_15, %c0_16, %c0_17], %18 {strides = array<i32>} : memref<1x8x32xf32, #tpu.memory_space<vmem>>, vector<1x8x32xf32>,
    %c0_18 = arith.constant 0 : index
    %c0_19 = arith.constant 0 : index
    %c0_20 = arith.constant 0 : index
    %20 = vector.load %arg7[%c0_18, %c0_19, %c0_20] : memref<1x8x8xf32, #tpu.memory_space<vmem>>, vector<1x8x8xf32>
    tpu.vector_store %arg7[%c0_18, %c0_19, %c0_20], %17 {strides = array<i32>} : memref<1x8x8xf32, #tpu.memory_space<vmem>>, vector<1x8x8xf32>,
    return
  }
  func.func @transform_0(%arg0: i32, %arg1: i32) -> (i32, i32, i32) {
    %c0_i32 = arith.constant 0 : i32
    %c0_i32_0 = arith.constant 0 : i32
    %c0_i32_1 = arith.constant 0 : i32
    return %arg0, %c0_i32, %c0_i32_0 : i32, i32, i32
  }
  func.func @transform_1(%arg0: i32, %arg1: i32) -> (i32, i32, i32) {
    %c0_i32 = arith.constant 0 : i32
    %c0_i32_0 = arith.constant 0 : i32
    return %arg0, %arg1, %c0_i32 : i32, i32, i32
  }
  func.func @transform_2(%arg0: i32, %arg1: i32) -> (i32, i32, i32) {
    %c0_i32 = arith.constant 0 : i32
    %c0_i32_0 = arith.constant 0 : i32
    %c0_i32_1 = arith.constant 0 : i32
    return %arg0, %c0_i32, %c0_i32_0 : i32, i32, i32
  }
  func.func @transform_3(%arg0: i32, %arg1: i32) -> (i32, i32, i32) {
    %c0_i32 = arith.constant 0 : i32
    %c0_i32_0 = arith.constant 0 : i32
    %c0_i32_1 = arith.constant 0 : i32
    return %arg0, %c0_i32, %c0_i32_0 : i32, i32, i32
  }
  func.func @transform_4(%arg0: i32, %arg1: i32) -> (i32, i32, i32) {
    %c0_i32 = arith.constant 0 : i32
    %c0_i32_0 = arith.constant 0 : i32
    return %arg0, %arg1, %c0_i32 : i32, i32, i32
  }
  func.func @transform_5(%arg0: i32, %arg1: i32) -> (i32, i32, i32) {
    %c0_i32 = arith.constant 0 : i32
    %c0_i32_0 = arith.constant 0 : i32
    return %arg0, %arg1, %c0_i32 : i32, i32, i32
  }
}

</mosaic_0001>

<bundles_post_ra>
// kernel: tpu_custom_call.1
= control target key start
LH: loop header
LB: loop body
LE: loop exit
PB: predicated region body
PF: predicated region fallthrough
CT: control target
= control target key end

     0   :  { %11 = vsyncpa [#allocation3], 0  ;;  %s1429_s0 = inlined_call_operand.hbm [shape: f32[2,1,8], index: 0, kind: input, shape index: {}]   ;;  %s1430_s1 = inlined_call_operand.hbm [shape: f32[2,8,32], index: 1, kind: input, shape index: {}]   ;;  %s1431_s2 = inlined_call_operand.hbm [shape: f32[2,8,32], index: 2, kind: input, shape index: {}]   ;;  %s1432_s3 = inlined_call_operand.hbm [shape: f32[2,8,32], index: 3, kind: input, shape index: {}]   ;;  %s1433_s4 = inlined_call_operand.hbm [shape: f32[2,8,32], index: 4, kind: output, shape index: {0}]   ;;  %s1434_s5 = inlined_call_operand.hbm [shape: f32[2,8,8], index: 5, kind: output, shape index: {1}]  }
   0x1   :  { %12 = vsyncpa [#allocation6], 0 }
   0x2   :  { %14 = vsyncpa [#allocation6 + $0x1], 0 }
   0x3   :  { %15 = vsyncpa [#allocation9], 0 }
   0x4   :  { %16 = vsyncpa [#allocation4], 0 }
   0x5   :  { %18 = vsyncpa [#allocation4 + $0x1], 0 }
   0x6   :  { %19 = vsyncpa [#allocation12], 0 }
   0x7   :  { %21 = vsyncpa [#allocation12 + $0x1], 0  ;;  %s1103_s18 = smov 0   ;;  %s1105_s19 = smov 0  }
   0x8   :  { %s1107_s20 = smov 0   ;;  %s1109_s21 = smov 0  }
   0x9   :  { %s1111_s22 = smov 0   ;;  %s1113_s23 = smov 0  }
   0xa LB: > { %s1132_s24 = sadd.s32 4294967295, %s1063_s23   ;;  %s689_s25 = sadd.s32 4294967294, %s1063_s23   ;;  %s1063_s23 = sphi %s1113_s23, %s27_s23   ;;  %s1059_s22 = sphi %s1111_s22, %s1460_s22   ;;  %s1055_s21 = sphi %s1109_s21, %s1459_s21   ;;  %s1051_s20 = sphi %s1107_s20, %s1458_s20   ;;  %s1047_s19 = sphi %s1105_s19, %s1457_s19   ;;  %s1043_s18 = sphi %s1103_s18, %s1456_s18  }
   0xb   : > { %p59_p0 = scmp.ne.s32.totalorder %s1047_s19, %s1043_s18  ;;  %p60_p1 = scmp.eq.s32.totalorder %s1132_s24, 0 }
   0xc   : > { %p171_p3 = scmp.eq.s32.totalorder %s689_s25, 1  ;;  %p690_p5 = scmp.ge.s32.totalorder %s1063_s23, 1 }
   0xd   : > { %p1139_p4 = por %p60_p1, %p59_p0  ;;  %p206_p7 = scmp.lt.s32.totalorder %s1063_s23, 3 }
   0xe   : > { %p1144_p6 = por %p171_p3, %p59_p0  ;;  %s1149_s28 = sshll.u32 %s1055_s21, 7 }
   0xf   : > { %s1440_s26 = scalar_select %p1139_p4, 1, 0 }
  0x10   : > { %s1441_s27 = scalar_select %p1144_p6, 1, 0 }
  0x11   : > { %p1151_p8 = pnand %p690_p5, %p206_p7  ;;  %s1159_s7 = scalar_lea.hbm %s1431_s2, %s1149_s28 }
  0x12   : > { %s1065_s8 = smov [#allocation7]   ;;  %s691_s10 = sshll.u32 %s1055_s21, 4 }
  0x13   : > { %s1442_s29 = scalar_select %p1151_p8, 1, 0 }
  0x14   : > { %s234_s9 = sshll.u32 %s1065_s8, 4  ;;  %p737_p10 = pneg %p1151_p8  ;;  %s1164_s9 = int_to_ptr.vmem [resolvable:$true] %s234_s9 }
  0x15   : > { %s1175_s14 = scalar_lea.hbm %s1429_s0, %s691_s10  ;;  %s1066_s15 = smov [#allocation2]  }
  0x16   : > { %p1168_p11 = pnand %p737_p10, %p1139_p4  ;;  %s221_s16 = sshll.u32 %s1066_s15, 4  ;;  %s1183_s16 = int_to_ptr.vmem [resolvable:$true] %s221_s16 }
  0x17   : > { %s1181_s30 = scalar_lea.hbm %s1432_s3, %s1149_s28  ;;  %s817_s21 = scalar_lea.hbm %s1159_s7, 128 }
  0x18   : > { %s1443_s11 = scalar_select %p1168_p11, 1, 0 }
  0x19   : > { %p818_p12 = scmp.ne.s32.totalorder %s1159_s7, %s817_s21  ;;  %p1189_p13 = pneg %p1168_p11 }
  0x1a   : > { %s822_s12 = scalar_lea.hbm %s1431_s2, 256  ;;  %p823_p3 = scmp.lt.u32.totalorder %s1159_s7, %s1431_s2 }
  0x1b   : > { %p820_p0 = pnand %p1189_p13, %p818_p12  ;;  %p824_p5 = scmp.lt.u32.totalorder %s822_s12, %s817_s21 }
  0x1c   : > { %p826_p10 = scmp.lt.u32.totalorder %s817_s21, %s1159_s7 }
  0x1d   : > { %p821_p1 = pneg %p820_p0  ;;  %p825_p7 = por %p824_p5, %p823_p3 }
  0x1f   : > { %p827_p9 = por %p826_p10, %p825_p7 }
  0x21   : > { %p828_p2 = pnand %p827_p9, %p821_p1 }
  0x23   : > { %831 = shalt.err (!%p828_p2)
}
  0x24   : > { %s832_s17 = scalar_lea.vmem %s1164_s9, 128  ;;  %p840_p4 = scmp.lt.s32.totalorder %s1164_s9, %s1164_s9 }
  0x25   : > { %p833_p12 = scmp.ne.s32.totalorder %s1164_s9, %s832_s17  ;;  %p841_p8 = scmp.lt.s32.totalorder %s832_s17, %s832_s17 }
  0x27   : > { %p835_p0 = pnand %p833_p12, %p1189_p13  ;;  %p842_p11 = por %p841_p8, %p840_p4 }
  0x29   : > { %p836_p6 = pneg %p835_p0 }
  0x2b   : > { %p843_p3 = pnand %p842_p11, %p836_p6 }
  0x2d   : > { %846 = shalt.err (!%p843_p3)
}
  0x2e   : > { %p1445_p5 = scmp.ne.s32.totalorder %s1443_s11, 0  ;;  %s847_s25 = scalar_lea.hbm %s1175_s14, 16 }
  0x2f   : > { %p848_p2 = scmp.ne.s32.totalorder %s1175_s14, %s847_s25  ;;  %s852_s10 = scalar_lea.hbm %s1429_s0, 32 }
  0x30   : > { %743 = dma.hbm_to_vmem [thread:$0]  (!%p1445_p5), %s1159_s7, 128, %s1164_s9, [#allocation6]  }
  0x31   : > { %p850_p9 = pnand %p848_p2, %p1189_p13  ;;  %p853_p4 = scmp.lt.u32.totalorder %s1175_s14, %s1429_s0 }
  0x32   : > { %p854_p6 = scmp.lt.u32.totalorder %s852_s10, %s847_s25  ;;  %p856_p11 = scmp.lt.u32.totalorder %s847_s25, %s1175_s14 }
  0x33   : > { %p851_p1 = pneg %p850_p9 }
  0x34   : > { %p855_p8 = por %p854_p6, %p853_p4 }
  0x36   : > { %p857_p7 = por %p856_p11, %p855_p8 }
  0x38   : > { %p858_p10 = pnand %p857_p7, %p851_p1 }
  0x3a   : > { %861 = shalt.err (!%p858_p10)
}
  0x3b   : > { %s862_s7 = scalar_lea.vmem %s1183_s16, 16  ;;  %s869_s9 = scalar_lea.vmem %s1183_s16, 32 }
  0x3c   : > { %p863_p12 = scmp.ne.s32.totalorder %s1183_s16, %s862_s7  ;;  %p870_p2 = scmp.lt.s32.totalorder %s1183_s16, %s1183_s16 }
  0x3d   : > { %p871_p9 = scmp.lt.s32.totalorder %s869_s9, %s862_s7 }
  0x3e   : > { %p865_p0 = pnand %p863_p12, %p1189_p13 }
  0x3f   : > { %p872_p5 = por %p871_p9, %p870_p2 }
  0x40   : > { %p866_p3 = pneg %p865_p0 }
  0x42   : > { %p873_p4 = pnand %p872_p5, %p866_p3 }
  0x44   : > { %876 = shalt.err (!%p873_p4)
}
  0x45   : > { %p1446_p1 = scmp.ne.s32.totalorder %s1443_s11, 0  ;;  %s1067_s15 = smov [#allocation8]  }
  0x46   : > { %s247_s17 = sshll.u32 %s1067_s15, 4  ;;  %s877_s25 = scalar_lea.hbm %s1181_s30, 128  ;;  %s248_s17 = int_to_ptr.vmem [resolvable:$true] %s247_s17 }
  0x47   : > { %740 = dma.hbm_to_vmem [thread:$0]  (!%p1446_p1), %s1175_s14, 16, %s1183_s16, [#allocation3]  }
  0x48   : > { %p878_p6 = scmp.ne.s32.totalorder %s1181_s30, %s877_s25  ;;  %s882_s10 = scalar_lea.hbm %s1432_s3, 256 }
  0x49   : > { %p883_p5 = scmp.lt.u32.totalorder %s1181_s30, %s1432_s3  ;;  %p884_p7 = scmp.lt.u32.totalorder %s882_s10, %s877_s25 }
  0x4a   : > { %p880_p8 = pnand %p878_p6, %p1189_p13  ;;  %p886_p12 = scmp.lt.u32.totalorder %s877_s25, %s1181_s30 }
  0x4b   : > { %p885_p10 = por %p884_p7, %p883_p5 }
  0x4c   : > { %p881_p11 = pneg %p880_p8 }
  0x4d   : > { %p887_p0 = por %p886_p12, %p885_p10 }
  0x4f   : > { %p888_p3 = pnand %p887_p0, %p881_p11 }
  0x51   : > { %891 = shalt.err (!%p888_p3)
}
  0x52   : > { %s892_s14 = scalar_lea.vmem %s248_s17, 128  ;;  %p900_p6 = scmp.lt.s32.totalorder %s248_s17, %s248_s17 }
  0x53   : > { %p893_p2 = scmp.ne.s32.totalorder %s248_s17, %s892_s14  ;;  %p901_p8 = scmp.lt.s32.totalorder %s892_s14, %s892_s14 }
  0x55   : > { %p895_p9 = pnand %p893_p2, %p1189_p13  ;;  %p902_p1 = por %p901_p8, %p900_p6 }
  0x57   : > { %p896_p4 = pneg %p895_p9 }
  0x59   : > { %p903_p5 = pnand %p902_p1, %p896_p4 }
  0x5b   : > { %906 = shalt.err (!%p903_p5)
}
  0x5c   : > { %p1447_p7 = scmp.ne.s32.totalorder %s1443_s11, 0  ;;  %s39_s16 = sadd.s32 1, %s1059_s22 }
  0x5d   : > { %p41_p13 = scmp.ge.s32.totalorder %s39_s16, 2  ;;  %s46_s6 = sadd.s32 1, %s1051_s20 }
  0x5e   : > { %746 = dma.hbm_to_vmem [thread:$0]  (!%p1447_p7), %s1181_s30, 128, %s248_s17, [#allocation9]  }
  0x5f   : > { %p81_p1 = scmp.ne.s32.totalorder %s1051_s20, %s1047_s19  ;;  %p82_p11 = scmp.eq.s32.totalorder %s1063_s23, 0 }
  0x60   : > { %s1462_s16 = smov (%p41_p13, %s39_s16), 0  ;;  %p1449_p12 = scmp.eq.s32.totalorder %s1132_s24, 1 }
  0x61   : > { %p1260_p10 = por %p82_p11, %p81_p1  ;;  %s43_s30 = ssub.s32 %s1059_s22, %s1462_s16 }
  0x62   : > { %p1266_p0 = por %p1449_p12, %p81_p1  ;;  %p758_p3 = scmp.lt.s32.totalorder %s1063_s23, 2 }
  0x63   : > { %p44_p2 = scmp.eq.s32.totalorder %s43_s30, 0  ;;  %s258_s9 = sand.u32 1, %s1063_s23  }
  0x64   : > { %s260_s15 = sand.u32 1, %s1051_s20   ;;  %s696_s21 = sshll.u32 %s1059_s22, 7 }
  0x65   : > { %s1276_s17 = scalar_select %p44_p2, %s1051_s20, %s46_s6  }
  0x66   : > { %s695_s25 = sshll.u32 %s260_s15, 3  ;;  %s1282_s12 = scalar_lea.hbm %s1430_s1, %s696_s21 }
  0x67   : > { %s262_s13 = scalar_lea.vmem [#allocation5], %s695_s25  ;;  %p1286_p9 = pnand %p758_p3, %p1260_p10 }
  0x68   : > { %s270_s14 = sshll.u32 %s262_s13, 4  ;;  %s259_s6 = scalar_lea.sflag [#allocation6], %s258_s9  ;;  %s1290_s14 = int_to_ptr.vmem [resolvable:$true] %s270_s14 }
  0x69   : > { %s907_s15 = scalar_lea.hbm %s1282_s12, 128  ;;  %p909_p6 = pneg %p1286_p9 }
  0x6a   : > { %p908_p4 = scmp.ne.s32.totalorder %s1282_s12, %s907_s15  ;;  %s912_s11 = scalar_lea.hbm %s1430_s1, 256 }
  0x6b   : > { %p913_p7 = scmp.lt.u32.totalorder %s1282_s12, %s1430_s1  ;;  %p914_p13 = scmp.lt.u32.totalorder %s912_s11, %s907_s15 }
  0x6c   : > { %p910_p8 = pnand %p909_p6, %p908_p4  ;;  %p916_p11 = scmp.lt.u32.totalorder %s907_s15, %s1282_s12 }
  0x6d   : > { %p915_p1 = por %p914_p13, %p913_p7 }
  0x6e   : > { %p911_p5 = pneg %p910_p8 }
  0x6f   : > { %p917_p10 = por %p916_p11, %p915_p1 }
  0x71   : > { %p918_p12 = pnand %p917_p10, %p911_p5 }
  0x73   : > { %921 = shalt.err (!%p918_p12)
}
  0x74   : > { %s922_s9 = scalar_lea.vmem %s1290_s14, 128  ;;  %s1068_s13 = smov [#allocation5]  }
  0x75   : > { %p923_p3 = scmp.ne.s32.totalorder %s1290_s14, %s922_s9  ;;  %s927_s25 = sshll.u32 %s1068_s13, 4  ;;  %s928_s25 = int_to_ptr.vmem [resolvable:$false] %s927_s25 }
  0x76   : > { %s929_s21 = scalar_lea.vmem %s928_s25, 256  ;;  %p930_p8 = scmp.lt.s32.totalorder %s1290_s14, %s928_s25 }
  0x77   : > { %p925_p2 = pnand %p923_p3, %p909_p6  ;;  %p931_p7 = scmp.lt.s32.totalorder %s929_s21, %s922_s9 }
  0x79   : > { %p926_p4 = pneg %p925_p2  ;;  %p932_p13 = por %p931_p7, %p930_p8 }
  0x7b   : > { %p933_p1 = pnand %p932_p13, %p926_p4 }
  0x7d   : > { %936 = shalt.err (!%p933_p1)
}
  0x7e   : > { %750 = dma.hbm_to_vmem [thread:$0]  (!%p1286_p9), %s1282_s12, 128, %s1290_s14, %s259_s6  }
  0x7f   : > { %p1452_p5 = scmp.ne.s32.totalorder %s1442_s29, 0 }
  0x80   : > { %p1453_p6 = scmp.ne.s32.totalorder (!%p1452_p5), %s1440_s26, 0 }
  0x81   : > { %279 = sbr.rel (%p1452_p5) target bundleno = 905 (0x389), region = 36 }
  0x88   : > { %1018 = dma.done.wait (%p1453_p6), [#allocation3], 16  }
  0x89   : > { %1020 = vsyncadd (%p1453_p6), [#allocation3], 4294967280  ;;  %s285_s15 = sand.u32 1, %s1132_s24   ;;  %s1325_s11 = sand.u32 1, %s1047_s19  }
  0x8a   : > { %s1328_s30 = sshll.u32 %s1325_s11, 3  ;;  %s286_s12 = scalar_lea.sflag [#allocation6], %s285_s15 }
  0x8b   : > { %s289_s14 = scalar_lea.vmem [#allocation5], %s1328_s30 }
  0x8c   : > { %1022 = dma.done.wait (%p1453_p6), %s286_s12, 128  }
  0x8d   : > { %1024 = vsyncadd (%p1453_p6), %s286_s12, 4294967168 }
  0x8e   : > { %1026 = dma.done.wait (%p1453_p6), [#allocation6], 128  }
  0x8f   : > { %1028 = vsyncadd (%p1453_p6), [#allocation6], 4294967168 }
  0x90   : > { %1030 = dma.done.wait (%p1453_p6), [#allocation9], 128  }
  0x91   : > { %1032 = vsyncadd (%p1453_p6), [#allocation9], 4294967168  ;;  %v1069_v0 = vmov 0.0   ;;  %vm1070_vm0 = vmmov 0   ;;  %vm339_vm1 = vcmask 261120   ;;  %v330_v1 = vld [vmem:[#allocation7] sm:$0xff]  ;;  %s1354_s8 = scalar_lea.hbm %s1434_s5, %s1149_s28 }
  0x92   : > { %715 = vmatprep.subr.mxu0 %v1069_v0  ;;  %717 = vmatprep.mubr.msk.f32.mxu0 %vm1070_vm0, %v1069_v0  ;;  %v329_v2 = vld [vmem:[%s289_s14] sm:$0xff]  ;;  %v701_v3 = vld [vmem:[#allocation2] ss:$0 sm:$0xff]  ;;  %vm416_vm2 = vcmask 64512   ;;  %s328_s24 = scalar_lea.vmem [#allocation11], %s1328_s30  ;;  %s510_s10 = scalar_lea.sflag [#allocation12], %s1325_s11 }
  0x93   : > { %720 = vmatprep.subr.mxu1 %v1069_v0  ;;  %722 = vmatprep.mubr.msk.f32.mxu1 %vm1070_vm0, %v1069_v0  ;;  %v331_v13 = vld [vmem:[#allocation8] sm:$0xff]  ;;  %s538_s26 = sshll.u32 %s328_s24, 4  ;;  %s1071_s13 = smov [#allocation11]   ;;  %s539_s26 = int_to_ptr.vmem [resolvable:$true] %s538_s26 }
  0x94   : > { %716 = vmatpush3.xpose.msk.msra.mxu0 %vm339_vm1, %v330_v1  ;;  %721 = vmatpush3.msra.mxu1 %v331_v13  ;;  %s937_s9 = scalar_lea.vmem %s539_s26, 128  ;;  %s941_s25 = sshll.u32 %s1071_s13, 4  ;;  %s942_s25 = int_to_ptr.vmem [resolvable:$false] %s941_s25 }
  0x95   : > { %p938_p9 = scmp.ne.s32.totalorder %s539_s26, %s937_s9  ;;  %s943_s21 = scalar_lea.vmem %s942_s25, 256 }
  0x96   : > { %p944_p12 = scmp.lt.s32.totalorder %s539_s26, %s942_s25  ;;  %p945_p3 = scmp.lt.s32.totalorder %s943_s21, %s937_s9 }
  0x97   : > { %718 = vmatmul.mubr.msk.f32.vlgmr.msra.gmra.mrb[0].mxu0 %vm339_vm1, %v329_v2  ;;  %p939_p11 = pnand %p938_p9, %p1266_p0 }
  0x98   : > { %p946_p2 = por %p945_p3, %p944_p12 }
  0x99   : > { %p940_p10 = pneg %p939_p11 }
  0x9b   : > { %p947_p4 = pnand %p946_p2, %p940_p10 }
 0x16a   : > { %v412_v4 = vpop.f32.mrb[0].mxu0 }
 0x16b   : > { %v413_v5 = vadd.f32 %v701_v3, %v412_v4  ;;  %v719_v6 = vpop.f32.mrb[1].mxu0 }
 0x16d   : > { %v417_v7 = vsel %vm416_vm2, %v413_v5, -inf }
 0x16e   : > { %418 = vmax.xlane.f32.xlu0 %v417_v7 }
 0x1fb   : > { %v419_v8 = vpop.xlane.xlu0 %418 }
 0x1fc   : > { %v420_v9 = vsub.f32 %v413_v5, %v419_v8 }
 0x1fe   : > { %v421_v10 = vmul.f32 1.442695, %v420_v9 }
 0x200   : > { %813 = vpow2.f32 %v421_v10 }
 0x20a   : > { %v814_v11 = vpop.eup %813 }
 0x20b   : > { %v423_v12 = vsel %vm416_vm2, %v814_v11, 0.0 }
 0x20c   : > { %424 = vadd.xlane.f32.xlu0 %v423_v12 }
 0x299   : > { %v425_v14 = vpop.xlane.xlu0 %424 }
 0x29a   : > { %815 = vrcp.f32 %v425_v14 }
 0x2a4   : > { %v816_v15 = vpop.eup %815 }
 0x2a5   : > { %v428_v16 = vmul.f32 %v816_v15, %v814_v11 }
 0x2a7   : > { %723 = vmatmul.mubr.msk.f32.vlgmr.msra.gmra.mrb[0].mxu1 %vm416_vm2, %v428_v16  ;;  %503 = vst.msk [vmem:[%s328_s24] sm:$0xff] %vm416_vm2, %v428_v16 }
 0x2a8   : > { %950 = shalt.err (!%p947_p4)
}
 0x2a9   : > { %s951_s15 = scalar_lea.hbm %s1354_s8, 128  ;;  %s955_s24 = scalar_lea.hbm %s1434_s5, 256 }
 0x2aa   : > { %p952_p8 = scmp.ne.s32.totalorder %s1354_s8, %s951_s15  ;;  %p956_p1 = scmp.lt.u32.totalorder %s1354_s8, %s1434_s5 }
 0x2ab   : > { %p957_p5 = scmp.lt.u32.totalorder %s955_s24, %s951_s15  ;;  %p959_p9 = scmp.lt.u32.totalorder %s951_s15, %s1354_s8 }
 0x2ac   : > { %p953_p7 = pnand %p952_p8, %p1266_p0 }
 0x2ad   : > { %p958_p6 = por %p957_p5, %p956_p1 }
 0x2ae   : > { %p954_p13 = pneg %p953_p7 }
 0x2af   : > { %p960_p11 = por %p959_p9, %p958_p6 }
 0x2b1   : > { %p961_p10 = pnand %p960_p11, %p954_p13 }
 0x2b3   : > { %964 = shalt.err (!%p961_p10)
}
 0x2b4   : > { %734 = dma.vmem_to_hbm [thread:$0]  (%p1266_p0), %s539_s26, 128, %s1354_s8, %s510_s10  }
 0x2b5   : > { %s321_s9 = scalar_lea.vmem [#allocation10], %s1328_s30  ;;  %s1379_s12 = scalar_lea.hbm %s1433_s4, %s1149_s28 }
 0x2b6   : > { %s524_s13 = sshll.u32 %s321_s9, 4  ;;  %s505_s15 = scalar_lea.sflag [#allocation4], %s1325_s11  ;;  %s1381_s13 = int_to_ptr.vmem [resolvable:$true] %s524_s13 }
 0x2b7   : > { %s965_s14 = scalar_lea.vmem %s1381_s13, 128  ;;  %s1072_s30 = smov [#allocation10]  }
 0x2b8   : > { %p966_p12 = scmp.ne.s32.totalorder %s1381_s13, %s965_s14  ;;  %s969_s26 = sshll.u32 %s1072_s30, 4  ;;  %s970_s26 = int_to_ptr.vmem [resolvable:$false] %s969_s26 }
 0x2b9   : > { %s971_s28 = scalar_lea.vmem %s970_s26, 256  ;;  %p972_p4 = scmp.lt.s32.totalorder %s1381_s13, %s970_s26 }
 0x2ba   : > { %p967_p3 = pnand %p966_p12, %p1266_p0  ;;  %p973_p8 = scmp.lt.s32.totalorder %s971_s28, %s965_s14 }
 0x2bc   : > { %p968_p2 = pneg %p967_p3  ;;  %p974_p7 = por %p973_p8, %p972_p4 }
 0x2be   : > { %p975_p13 = pnand %p974_p7, %p968_p2 }
 0x37a   : > { %v498_v17 = vpop.f32.mrb[0].mxu1 }
 0x37b   : > { %502 = vst.msk [vmem:[%s321_s9] sm:$0xff] %vm339_vm1, %v498_v17  ;;  %v724_v18 = vpop.f32.mrb[1].mxu1 }
 0x37c   : > { %978 = shalt.err (!%p975_p13)
}
 0x37d   : > { %s979_s11 = scalar_lea.hbm %s1379_s12, 128  ;;  %s983_s24 = scalar_lea.hbm %s1433_s4, 256 }
 0x37e   : > { %p980_p1 = scmp.ne.s32.totalorder %s1379_s12, %s979_s11  ;;  %p984_p9 = scmp.lt.u32.totalorder %s1379_s12, %s1433_s4 }
 0x37f   : > { %p985_p11 = scmp.lt.u32.totalorder %s983_s24, %s979_s11  ;;  %p987_p12 = scmp.lt.u32.totalorder %s979_s11, %s1379_s12 }
 0x380   : > { %p981_p5 = pnand %p980_p1, %p1266_p0 }
 0x381   : > { %p986_p10 = por %p985_p11, %p984_p9 }
 0x382   : > { %p982_p6 = pneg %p981_p5 }
 0x383   : > { %p988_p3 = por %p987_p12, %p986_p10 }
 0x385   : > { %p989_p2 = pnand %p988_p3, %p982_p6 }
 0x387   : > { %992 = shalt.err (!%p989_p2)
}
 0x388   : > { %733 = dma.vmem_to_hbm [thread:$0]  (%p1266_p0), %s1381_s13, 128, %s1379_s12, %s505_s15  }
 0x389 PF: > { %s550_s9 = sand.u32 1, %s1043_s18   ;;  %p1454_p4 = scmp.ne.s32.totalorder %s1441_s27, 0 }
 0x38a   : > { %p1455_p8 = scmp.ge.s32.totalorder %s1063_s23, 2  ;;  %s551_s25 = scalar_lea.sflag [#allocation4], %s550_s9 }
 0x38c   : > { %p752_p7 = pnand %p1455_p8, %p1454_p4 }
 0x38e   : > { %1034 = dma.done.wait (!%p752_p7), %s551_s25, 128  }
 0x38f   : > { %1036 = vsyncadd (!%p752_p7), %s551_s25, 4294967168  ;;  %s560_s21 = scalar_lea.sflag [#allocation12], %s550_s9 }
 0x390   : > { %1038 = dma.done.wait (!%p752_p7), %s560_s21, 128  }
 0x391   : > { %1040 = vsyncadd (!%p752_p7), %s560_s21, 4294967168  ;;  %s27_s23 = sadd.s32 1, %s1063_s23   ;;  %s1456_s18 = smov %s1047_s19 }
 0x392   : > { %p24_p13 = scmp.ge.s32.totalorder %s27_s23, 4   ;;  %s1457_s19 = smov %s1051_s20 }
 0x393   : > { %s1458_s20 = smov %s1276_s17  ;;  %s1459_s21 = smov %s1059_s22 }
 0x394   : > { %s1460_s22 = smov %s1462_s16  ;;  %26 = sbr.rel (!%p24_p13) target bundleno = 10 (0xa), region = 114 }
 0x39b   :  { %565 = vsyncpa [#allocation3], 1 }
 0x39c   :  { %567 = vsyncpa [#allocation3 + $0x1], 1 }
 0x39d   :  { %568 = vsyncpa [#allocation6], 1 }
 0x39e   :  { %570 = vsyncpa [#allocation6 + $0x1], 1 }
 0x39f   :  { %571 = vsyncpa [#allocation9], 1 }
 0x3a0   :  { %572 = vsyncpa [#allocation4], 1 }
 0x3a1   :  { %574 = vsyncpa [#allocation4 + $0x1], 1 }
 0x3a2   :  { %575 = vsyncpa [#allocation12], 1 }
 0x3a3   :  { %577 = vsyncpa [#allocation12 + $0x1], 1 }

// kernel: tpu_custom_call.1
= control target key start
LH: loop header
LB: loop body
LE: loop exit
PB: predicated region body
PF: predicated region fallthrough
CT: control target
= control target key end

     0   :  { %s1495_s0 = inlined_call_operand.hbm [shape: f32[2,1,8], index: 0, kind: input, shape index: {}]   ;;  %s1496_s1 = inlined_call_operand.hbm [shape: f32[2,8,32], index: 1, kind: input, shape index: {}]   ;;  %s1497_s2 = inlined_call_operand.hbm [shape: f32[2,8,32], index: 2, kind: input, shape index: {}]   ;;  %s1498_s3 = inlined_call_operand.hbm [shape: f32[2,8,32], index: 3, kind: input, shape index: {}]   ;;  %s1499_s4 = inlined_call_operand.hbm [shape: f32[2,8,32], index: 4, kind: output, shape index: {0}]   ;;  %s1500_s5 = inlined_call_operand.hbm [shape: f32[2,8,8], index: 5, kind: output, shape index: {1}]  }
   0x1   :  { %1510 = sst [smem:[#allocation23_spill]] %s1496_s1 }
   0x2   :  { %11 = vsyncpa [#allocation3], 0 }
   0x3   :  { %13 = vsyncpa [#allocation3 + $0x1], 0 }
   0x4   :  { %14 = vsyncpa [#allocation6], 0 }
   0x5   :  { %16 = vsyncpa [#allocation6 + $0x1], 0 }
   0x6   :  { %17 = vsyncpa [#allocation9], 0 }
   0x7   :  { %19 = vsyncpa [#allocation9 + $0x1], 0 }
   0x8   :  { %20 = vsyncpa [#allocation4], 0 }
   0x9   :  { %22 = vsyncpa [#allocation4 + $0x1], 0 }
   0xa   :  { %23 = vsyncpa [#allocation12], 0 }
   0xb   :  { %25 = vsyncpa [#allocation12 + $0x1], 0  ;;  %s1171_s18 = smov 0   ;;  %s1173_s19 = smov 0  }
   0xc   :  { %s1175_s20 = smov 0   ;;  %s1177_s21 = smov 0  }
   0xd   :  { %s1179_s22 = smov 0   ;;  %s1181_s23 = smov 0  }
   0xe LB: > { %1511 = sst [smem:[#allocation18_spill]] %s1119_s20  ;;  %s1202_s24 = sadd.s32 4294967295, %s1131_s23   ;;  %s1131_s23 = sphi %s1181_s23, %s31_s23   ;;  %s1127_s22 = sphi %s1179_s22, %s1538_s22   ;;  %s1123_s21 = sphi %s1177_s21, %s1537_s21   ;;  %s1119_s20 = sphi %s1175_s20, %s1536_s20   ;;  %s1115_s19 = sphi %s1173_s19, %s1540_s19   ;;  %s1111_s18 = sphi %s1171_s18, %s1539_s18  }
   0xf   : > { %1512 = sst [smem:[#allocation19_spill]] %s1127_s22  ;;  %s761_s25 = sadd.s32 4294967294, %s1131_s23  }
  0x10   : > { %1513 = sst [smem:[#allocation20_spill]] %s1131_s23  ;;  %s43_s26 = sadd.s32 1, %s1127_s22 }
  0x11   : > { %s50_s27 = sadd.s32 1, %s1119_s20  ;;  %p45_p0 = scmp.ge.s32.totalorder %s43_s26, 2 }
  0x12   : > { %p57_p1 = scmp.ne.s32.totalorder %s1119_s20, %s1115_s19  ;;  %p58_p2 = scmp.eq.s32.totalorder %s1131_s23, 0 }
  0x13   : > { %p63_p3 = scmp.ne.s32.totalorder %s1115_s19, %s1111_s18  ;;  %s1542_s26 = smov (%p45_p0, %s43_s26), 0 }
  0x14   : > { %1514 = sst [smem:[#allocation21_spill]] %s1542_s26  ;;  %p1214_p4 = por %p58_p2, %p57_p1 }
  0x15   : > { %p64_p5 = scmp.eq.s32.totalorder %s1202_s24, 0  ;;  %s47_s29 = ssub.s32 %s1127_s22, %s1542_s26 }
  0x16   : > { %p169_p6 = scmp.eq.s32.totalorder %s1202_s24, 1  ;;  %p48_p7 = scmp.eq.s32.totalorder %s47_s29, 0 }
  0x17   : > { %p1222_p8 = por %p64_p5, %p63_p3  ;;  %p175_p10 = scmp.eq.s32.totalorder %s761_s25, 1 }
  0x18   : > { %p1226_p9 = por %p169_p6, %p57_p1  ;;  %p833_p13 = scmp.lt.s32.totalorder %s1131_s23, 2 }
  0x19   : > { %s1516_s30 = scalar_select %p1222_p8, 1, 0 }
  0x1a   : > { %s1517_s6 = scalar_select %p1226_p9, 1, 0 }
  0x1b   : > { %s1231_s7 = scalar_select %p48_p7, %s1119_s20, %s50_s27  }
  0x1c   : > { %p1233_p11 = por %p175_p10, %p63_p3  ;;  %s1240_s9 = sand.u32 1, %s1119_s20  }
  0x1d   : > { %1518 = sst [smem:[#allocation22_spill]] %s1231_s7  ;;  %s240_s10 = sand.u32 1, %s1131_s23  }
  0x1e   : > { %s1519_s8 = scalar_select %p1233_p11, 1, 0 }
  0x1f   : > { %s1244_s11 = sshll.u32 %s1240_s9, 3  ;;  %p1248_p0 = pnand %p833_p13, %p1214_p4 }
  0x20   : > { %s1253_s13 = sshll.u32 %s1127_s22, 7  ;;  %s1521_s1 = sld [smem:[#allocation23_spill]] }
  0x21   : > { %s1520_s12 = scalar_select %p1248_p0, 1, 0 }
  0x22   : > { %s244_s17 = scalar_lea.vmem [#allocation5], %s1244_s11  ;;  %s1266_s27 = scalar_lea.sflag [#allocation6], %s240_s10 }
  0x23   : > { %s252_s25 = sshll.u32 %s244_s17, 4  ;;  %p1272_p4 = pneg %p1248_p0  ;;  %s1263_s25 = int_to_ptr.vmem [resolvable:$true] %s252_s25 }
  0x26   : > { %s1259_s16 = scalar_lea.hbm %s1521_s1, %s1253_s13  ;;  %s894_s17 = scalar_lea.hbm %s1521_s1, 256 }
  0x27   : > { %s889_s28 = scalar_lea.hbm %s1259_s16, 128  ;;  %p895_p7 = scmp.lt.u32.totalorder %s1259_s16, %s1521_s1 }
  0x28   : > { %p890_p3 = scmp.ne.s32.totalorder %s1259_s16, %s889_s28  ;;  %p896_p10 = scmp.lt.u32.totalorder %s894_s17, %s889_s28 }
  0x29   : > { %p898_p12 = scmp.lt.u32.totalorder %s889_s28, %s1259_s16 }
  0x2a   : > { %p892_p5 = pnand %p1272_p4, %p890_p3  ;;  %p897_p13 = por %p896_p10, %p895_p7 }
  0x2c   : > { %p893_p6 = pneg %p892_p5  ;;  %p899_p1 = por %p898_p12, %p897_p13 }
  0x2e   : > { %p900_p2 = pnand %p899_p1, %p893_p6 }
  0x30   : > { %903 = shalt.err (!%p900_p2)
}
  0x31   : > { %s904_s10 = scalar_lea.vmem %s1263_s25, 128  ;;  %s1133_s14 = smov [#allocation5]  }
  0x32   : > { %p905_p3 = scmp.ne.s32.totalorder %s1263_s25, %s904_s10  ;;  %s909_s15 = sshll.u32 %s1133_s14, 4  ;;  %s910_s15 = int_to_ptr.vmem [resolvable:$false] %s909_s15 }
  0x33   : > { %s911_s26 = scalar_lea.vmem %s910_s15, 256  ;;  %p912_p9 = scmp.lt.s32.totalorder %s1263_s25, %s910_s15 }
  0x34   : > { %p907_p5 = pnand %p905_p3, %p1272_p4  ;;  %p913_p8 = scmp.lt.s32.totalorder %s911_s26, %s904_s10 }
  0x36   : > { %p908_p11 = pneg %p907_p5  ;;  %p914_p7 = por %p913_p8, %p912_p9 }
  0x38   : > { %p915_p10 = pnand %p914_p7, %p908_p11 }
  0x3a   : > { %918 = shalt.err (!%p915_p10)
}
  0x3b   : > { %819 = dma.hbm_to_vmem [thread:$0]  (!%p1248_p0), %s1259_s16, 128, %s1263_s25, %s1266_s27  }
  0x3c   : > { %p1523_p12 = scmp.lt.s32.totalorder %s1131_s23, 3  ;;  %p1524_p1 = scmp.ge.s32.totalorder %s1131_s23, 1 }
  0x3d   : > { %s764_s28 = sshll.u32 %s1127_s22, 4  ;;  %s226_s15 = scalar_lea.vmem [#allocation2], %s1240_s9 }
  0x3e   : > { %p1300_p2 = pnand %p1524_p1, %p1523_p12  ;;  %s1308_s14 = scalar_lea.hbm %s1495_s0, %s764_s28 }
  0x3f   : > { %s233_s26 = sshll.u32 %s226_s15, 4  ;;  %s224_s16 = scalar_lea.sflag [#allocation3], %s1240_s9  ;;  %s234_s26 = int_to_ptr.vmem [resolvable:$true] %s233_s26 }
  0x40   : > { %s1525_s7 = scalar_select %p1300_p2, 1, 0 }
  0x41   : > { %s919_s25 = scalar_lea.hbm %s1308_s14, 16  ;;  %s924_s20 = scalar_lea.hbm %s1495_s0, 32 }
  0x42   : > { %p920_p8 = scmp.ne.s32.totalorder %s1308_s14, %s919_s25  ;;  %p925_p6 = scmp.lt.u32.totalorder %s1308_s14, %s1495_s0 }
  0x43   : > { %p926_p13 = scmp.lt.u32.totalorder %s924_s20, %s919_s25  ;;  %p928_p5 = scmp.lt.u32.totalorder %s919_s25, %s1308_s14 }
  0x44   : > { %p922_p9 = pnand %p920_p8, %p1272_p4 }
  0x45   : > { %p927_p3 = por %p926_p13, %p925_p6 }
  0x46   : > { %p923_p11 = pneg %p922_p9 }
  0x47   : > { %p929_p7 = por %p928_p5, %p927_p3 }
  0x49   : > { %p930_p10 = pnand %p929_p7, %p923_p11 }
  0x4b   : > { %933 = shalt.err (!%p930_p10)
}
  0x4c   : > { %s934_s10 = scalar_lea.vmem %s234_s26, 16  ;;  %s1134_s15 = smov [#allocation2]  }
  0x4d   : > { %p935_p12 = scmp.ne.s32.totalorder %s234_s26, %s934_s10  ;;  %s939_s23 = sshll.u32 %s1134_s15, 4  ;;  %s940_s23 = int_to_ptr.vmem [resolvable:$false] %s939_s23 }
  0x4e   : > { %s941_s1 = scalar_lea.vmem %s940_s23, 32  ;;  %p942_p9 = scmp.lt.s32.totalorder %s234_s26, %s940_s23 }
  0x4f   : > { %p937_p1 = pnand %p935_p12, %p1272_p4  ;;  %p943_p2 = scmp.lt.s32.totalorder %s941_s1, %s934_s10 }
  0x51   : > { %p938_p8 = pneg %p937_p1  ;;  %p944_p0 = por %p943_p2, %p942_p9 }
  0x53   : > { %p945_p6 = pnand %p944_p0, %p938_p8 }
  0x55   : > { %948 = shalt.err (!%p945_p6)
}
  0x56   : > { %p1526_p13 = scmp.ne.s32.totalorder %s1520_s12, 0  ;;  %s1333_s25 = scalar_lea.hbm %s1497_s2, %s1253_s13 }
  0x57   : > { %s263_s23 = scalar_lea.vmem [#allocation7], %s1244_s11  ;;  %s949_s28 = scalar_lea.hbm %s1333_s25, 128 }
  0x58   : > { %816 = dma.hbm_to_vmem [thread:$0]  (!%p1526_p13), %s1308_s14, 16, %s234_s26, %s224_s16  }
  0x59   : > { %s270_s17 = sshll.u32 %s263_s23, 4  ;;  %p950_p0 = scmp.ne.s32.totalorder %s1333_s25, %s949_s28  ;;  %s271_s17 = int_to_ptr.vmem [resolvable:$true] %s270_s17 }
  0x5a   : > { %s954_s14 = scalar_lea.hbm %s1497_s2, 256  ;;  %p955_p3 = scmp.lt.u32.totalorder %s1333_s25, %s1497_s2 }
  0x5b   : > { %p952_p2 = pnand %p950_p0, %p1272_p4  ;;  %p956_p5 = scmp.lt.u32.totalorder %s954_s14, %s949_s28 }
  0x5c   : > { %p958_p10 = scmp.lt.u32.totalorder %s949_s28, %s1333_s25 }
  0x5d   : > { %p953_p11 = pneg %p952_p2  ;;  %p957_p7 = por %p956_p5, %p955_p3 }
  0x5f   : > { %p959_p12 = por %p958_p10, %p957_p7 }
  0x61   : > { %p960_p1 = pnand %p959_p12, %p953_p11 }
  0x63   : > { %963 = shalt.err (!%p960_p1)
}
  0x64   : > { %s964_s1 = scalar_lea.vmem %s271_s17, 128  ;;  %s1135_s20 = smov [#allocation7]  }
  0x65   : > { %p965_p8 = scmp.ne.s32.totalorder %s271_s17, %s964_s1  ;;  %s969_s22 = sshll.u32 %s1135_s20, 4  ;;  %s970_s22 = int_to_ptr.vmem [resolvable:$false] %s969_s22 }
  0x66   : > { %s971_s23 = scalar_lea.vmem %s970_s22, 256  ;;  %p972_p0 = scmp.lt.s32.totalorder %s271_s17, %s970_s22 }
  0x67   : > { %p967_p9 = pnand %p965_p8, %p1272_p4  ;;  %p973_p2 = scmp.lt.s32.totalorder %s971_s23, %s964_s1 }
  0x69   : > { %p968_p6 = pneg %p967_p9  ;;  %p974_p13 = por %p973_p2, %p972_p0 }
  0x6b   : > { %p975_p3 = pnand %p974_p13, %p968_p6 }
  0x6d   : > { %978 = shalt.err (!%p975_p3)
}
  0x6e   : > { %p1527_p5 = scmp.ne.s32.totalorder %s1520_s12, 0  ;;  %s1358_s15 = scalar_lea.hbm %s1498_s3, %s1253_s13 }
  0x6f   : > { %s281_s14 = scalar_lea.vmem [#allocation8], %s1244_s11  ;;  %s278_s16 = scalar_lea.sflag [#allocation9], %s1240_s9 }
  0x70   : > { %822 = dma.hbm_to_vmem [thread:$0]  (!%p1527_p5), %s1333_s25, 128, %s271_s17, %s1266_s27  }
  0x71   : > { %s288_s26 = sshll.u32 %s281_s14, 4  ;;  %s979_s1 = scalar_lea.hbm %s1358_s15, 128  ;;  %s289_s26 = int_to_ptr.vmem [resolvable:$true] %s288_s26 }
  0x72   : > { %p980_p13 = scmp.ne.s32.totalorder %s1358_s15, %s979_s1  ;;  %s984_s25 = scalar_lea.hbm %s1498_s3, 256 }
  0x73   : > { %p985_p10 = scmp.lt.u32.totalorder %s1358_s15, %s1498_s3  ;;  %p986_p12 = scmp.lt.u32.totalorder %s984_s25, %s979_s1 }
  0x74   : > { %p982_p11 = pnand %p980_p13, %p1272_p4  ;;  %p988_p8 = scmp.lt.u32.totalorder %s979_s1, %s1358_s15 }
  0x75   : > { %p987_p1 = por %p986_p12, %p985_p10 }
  0x76   : > { %p983_p7 = pneg %p982_p11 }
  0x77   : > { %p989_p9 = por %p988_p8, %p987_p1 }
  0x79   : > { %p990_p6 = pnand %p989_p9, %p983_p7 }
  0x7b   : > { %993 = shalt.err (!%p990_p6)
}
  0x7c   : > { %s994_s9 = scalar_lea.vmem %s289_s26, 128  ;;  %s1136_s11 = smov [#allocation8]  }
  0x7d   : > { %p995_p0 = scmp.ne.s32.totalorder %s289_s26, %s994_s9  ;;  %s999_s22 = sshll.u32 %s1136_s11, 4  ;;  %s1000_s22 = int_to_ptr.vmem [resolvable:$false] %s999_s22 }
  0x7e   : > { %s1001_s23 = scalar_lea.vmem %s1000_s22, 256  ;;  %p1002_p13 = scmp.lt.s32.totalorder %s289_s26, %s1000_s22 }
  0x7f   : > { %p997_p2 = pnand %p995_p0, %p1272_p4  ;;  %p1003_p11 = scmp.lt.s32.totalorder %s1001_s23, %s994_s9 }
  0x81   : > { %p998_p3 = pneg %p997_p2  ;;  %p1004_p5 = por %p1003_p11, %p1002_p13 }
  0x83   : > { %p1005_p10 = pnand %p1004_p5, %p998_p3 }
  0x85   : > { %1008 = shalt.err (!%p1005_p10)
}
  0x86   : > { %p1528_p12 = scmp.ne.s32.totalorder %s1520_s12, 0  ;;  %p1529_p7 = scmp.ne.s32.totalorder %s1525_s7, 0 }
  0x87   : > { %s1382_s29 = sand.u32 (!%p1529_p7), 1, %s1115_s19   ;;  %p1530_p4 = scmp.ne.s32.totalorder (!%p1529_p7), %s1516_s30, 0 }
  0x88   : > { %825 = dma.hbm_to_vmem [thread:$0]  (!%p1528_p12), %s1358_s15, 128, %s289_s26, %s278_s16  }
  0x89   : > { %297 = sbr.rel (%p1529_p7) target bundleno = 911 (0x38f), region = 36  ;;  %s300_s28 = scalar_lea.sflag (!%p1529_p7), [#allocation3], %s1382_s29 }
  0x8a   : > { %s302_s10 = scalar_lea.vmem (!%p1529_p7), [#allocation2], %s1382_s29 }
  0x90   : > { %1090 = dma.done.wait (%p1530_p4), %s300_s28, 16  }
  0x91   : > { %1092 = vsyncadd (%p1530_p4), %s300_s28, 4294967280  ;;  %s307_s12 = sand.u32 1, %s1202_s24   ;;  %s1392_s15 = sshll.u32 %s1382_s29, 3 }
  0x92   : > { %s308_s7 = scalar_lea.sflag [#allocation6], %s307_s12  ;;  %s311_s14 = scalar_lea.vmem [#allocation5], %s1392_s15 }
  0x93   : > { %1094 = dma.done.wait (%p1530_p4), %s308_s7, 256  }
  0x94   : > { %1096 = vsyncadd (%p1530_p4), %s308_s7, 4294967040  ;;  %s320_s26 = scalar_lea.vmem [#allocation7], %s1392_s15  ;;  %s326_s16 = scalar_lea.sflag [#allocation9], %s1382_s29 }
  0x95   : > { %s329_s1 = scalar_lea.vmem [#allocation8], %s1392_s15 }
  0x96   : > { %1098 = dma.done.wait (%p1530_p4), %s326_s16, 128  }
  0x97   : > { %1100 = vsyncadd (%p1530_p4), %s326_s16, 4294967168  ;;  %v1137_v0 = vmov 0.0   ;;  %vm1138_vm0 = vmmov 0   ;;  %vm385_vm1 = vcmask 261120   ;;  %v376_v1 = vld [vmem:[%s320_s26] sm:$0xff]  ;;  %v375_v2 = vld [vmem:[%s311_s14] sm:$0xff] }
  0x98   : > { %791 = vmatprep.subr.mxu0 %v1137_v0  ;;  %793 = vmatprep.mubr.msk.f32.mxu0 %vm1138_vm0, %v1137_v0  ;;  %v777_v3 = vld [vmem:[%s302_s10] ss:$0 sm:$0xff]  ;;  %vm462_vm2 = vcmask 64512   ;;  %v377_v13 = vld [vmem:[%s329_s1] sm:$0xff]  ;;  %s374_s24 = scalar_lea.vmem [#allocation11], %s1392_s15  ;;  %s783_s30 = sshll.u32 %s1123_s21, 7 }
  0x99   : > { %796 = vmatprep.subr.mxu1 %v1137_v0  ;;  %798 = vmatprep.mubr.msk.f32.mxu1 %vm1138_vm0, %v1137_v0  ;;  %s1419_s25 = scalar_lea.hbm %s1500_s5, %s783_s30  ;;  %s584_s17 = sshll.u32 %s374_s24, 4  ;;  %s585_s17 = int_to_ptr.vmem [resolvable:$true] %s584_s17 }
  0x9a   : > { %792 = vmatpush3.xpose.msk.msra.mxu0 %vm385_vm1, %v376_v1  ;;  %797 = vmatpush3.msra.mxu1 %v377_v13  ;;  %s556_s13 = scalar_lea.sflag [#allocation12], %s1382_s29  ;;  %s1009_s9 = scalar_lea.vmem %s585_s17, 128 }
  0x9b   : > { %p1010_p5 = scmp.ne.s32.totalorder %s585_s17, %s1009_s9  ;;  %p1531_p1 = scmp.ne.s32.totalorder %s1517_s6, 0 }
  0x9c   : > { %s1139_s11 = smov [#allocation11]  }
  0x9d   : > { %794 = vmatmul.mubr.msk.f32.vlgmr.msra.gmra.mrb[0].mxu0 %vm385_vm1, %v375_v2  ;;  %p1011_p8 = pnand %p1010_p5, %p1531_p1  ;;  %s1013_s22 = sshll.u32 %s1139_s11, 4  ;;  %s1014_s22 = int_to_ptr.vmem [resolvable:$false] %s1013_s22 }
  0x9e   : > { %s1015_s23 = scalar_lea.vmem %s1014_s22, 256  ;;  %p1016_p6 = scmp.lt.s32.totalorder %s585_s17, %s1014_s22 }
  0x9f   : > { %p1012_p9 = pneg %p1011_p8  ;;  %p1017_p0 = scmp.lt.s32.totalorder %s1015_s23, %s1009_s9 }
  0xa1   : > { %p1018_p2 = por %p1017_p0, %p1016_p6 }
  0xa3   : > { %p1019_p3 = pnand %p1018_p2, %p1012_p9 }
 0x170   : > { %v458_v4 = vpop.f32.mrb[0].mxu0 }
 0x171   : > { %v459_v5 = vadd.f32 %v777_v3, %v458_v4  ;;  %v795_v6 = vpop.f32.mrb[1].mxu0 }
 0x173   : > { %v463_v7 = vsel %vm462_vm2, %v459_v5, -inf }
 0x174   : > { %464 = vmax.xlane.f32.xlu0 %v463_v7 }
 0x201   : > { %v465_v8 = vpop.xlane.xlu0 %464 }
 0x202   : > { %v466_v9 = vsub.f32 %v459_v5, %v465_v8 }
 0x204   : > { %v467_v10 = vmul.f32 1.442695, %v466_v9 }
 0x206   : > { %885 = vpow2.f32 %v467_v10 }
 0x210   : > { %v886_v11 = vpop.eup %885 }
 0x211   : > { %v469_v12 = vsel %vm462_vm2, %v886_v11, 0.0 }
 0x212   : > { %470 = vadd.xlane.f32.xlu0 %v469_v12 }
 0x29f   : > { %v471_v14 = vpop.xlane.xlu0 %470 }
 0x2a0   : > { %887 = vrcp.f32 %v471_v14 }
 0x2aa   : > { %v888_v15 = vpop.eup %887 }
 0x2ab   : > { %v474_v16 = vmul.f32 %v888_v15, %v886_v11 }
 0x2ad   : > { %799 = vmatmul.mubr.msk.f32.vlgmr.msra.gmra.mrb[0].mxu1 %vm462_vm2, %v474_v16  ;;  %549 = vst.msk [vmem:[%s374_s24] sm:$0xff] %vm462_vm2, %v474_v16 }
 0x2ae   : > { %1022 = shalt.err (!%p1019_p3)
}
 0x2af   : > { %s1023_s28 = scalar_lea.hbm %s1419_s25, 128  ;;  %s1027_s7 = scalar_lea.hbm %s1500_s5, 256 }
 0x2b0   : > { %p1024_p13 = scmp.ne.s32.totalorder %s1419_s25, %s1023_s28  ;;  %p1028_p12 = scmp.lt.u32.totalorder %s1419_s25, %s1500_s5 }
 0x2b1   : > { %p1029_p7 = scmp.lt.u32.totalorder %s1027_s7, %s1023_s28  ;;  %p1031_p5 = scmp.lt.u32.totalorder %s1023_s28, %s1419_s25 }
 0x2b2   : > { %p1025_p11 = pnand %p1024_p13, %p1531_p1 }
 0x2b3   : > { %p1030_p4 = por %p1029_p7, %p1028_p12 }
 0x2b4   : > { %p1026_p10 = pneg %p1025_p11 }
 0x2b5   : > { %p1032_p8 = por %p1031_p5, %p1030_p4 }
 0x2b7   : > { %p1033_p9 = pnand %p1032_p8, %p1026_p10 }
 0x2b9   : > { %1036 = shalt.err (!%p1033_p9)
}
 0x2ba   : > { %810 = dma.vmem_to_hbm [thread:$0]  (%p1531_p1), %s585_s17, 128, %s1419_s25, %s556_s13  }
 0x2bb   : > { %s367_s16 = scalar_lea.vmem [#allocation10], %s1392_s15  ;;  %s1445_s27 = scalar_lea.hbm %s1499_s4, %s783_s30 }
 0x2bc   : > { %s570_s1 = sshll.u32 %s367_s16, 4  ;;  %s551_s9 = scalar_lea.sflag [#allocation4], %s1382_s29  ;;  %s1447_s1 = int_to_ptr.vmem [resolvable:$true] %s570_s1 }
 0x2bd   : > { %s1037_s11 = scalar_lea.vmem %s1447_s1, 128  ;;  %s1140_s21 = smov [#allocation10]  }
 0x2be   : > { %p1038_p6 = scmp.ne.s32.totalorder %s1447_s1, %s1037_s11  ;;  %s1041_s15 = sshll.u32 %s1140_s21, 4  ;;  %s1042_s15 = int_to_ptr.vmem [resolvable:$false] %s1041_s15 }
 0x2bf   : > { %s1043_s30 = scalar_lea.vmem %s1042_s15, 256  ;;  %p1044_p3 = scmp.lt.s32.totalorder %s1447_s1, %s1042_s15 }
 0x2c0   : > { %p1039_p0 = pnand %p1038_p6, %p1531_p1  ;;  %p1045_p13 = scmp.lt.s32.totalorder %s1043_s30, %s1037_s11 }
 0x2c2   : > { %p1040_p2 = pneg %p1039_p0  ;;  %p1046_p11 = por %p1045_p13, %p1044_p3 }
 0x2c4   : > { %p1047_p10 = pnand %p1046_p11, %p1040_p2 }
 0x380   : > { %v544_v17 = vpop.f32.mrb[0].mxu1 }
 0x381   : > { %548 = vst.msk [vmem:[%s367_s16] sm:$0xff] %vm385_vm1, %v544_v17  ;;  %v800_v18 = vpop.f32.mrb[1].mxu1 }
 0x382   : > { %1050 = shalt.err (!%p1047_p10)
}
 0x383   : > { %s1051_s29 = scalar_lea.hbm %s1445_s27, 128  ;;  %s1055_s13 = scalar_lea.hbm %s1499_s4, 256 }
 0x384   : > { %p1052_p12 = scmp.ne.s32.totalorder %s1445_s27, %s1051_s29  ;;  %p1056_p5 = scmp.lt.u32.totalorder %s1445_s27, %s1499_s4 }
 0x385   : > { %p1057_p8 = scmp.lt.u32.totalorder %s1055_s13, %s1051_s29  ;;  %p1059_p6 = scmp.lt.u32.totalorder %s1051_s29, %s1445_s27 }
 0x386   : > { %p1053_p7 = pnand %p1052_p12, %p1531_p1 }
 0x387   : > { %p1058_p9 = por %p1057_p8, %p1056_p5 }
 0x388   : > { %p1054_p4 = pneg %p1053_p7 }
 0x389   : > { %p1060_p0 = por %p1059_p6, %p1058_p9 }
 0x38b   : > { %p1061_p2 = pnand %p1060_p0, %p1054_p4 }
 0x38d   : > { %1064 = shalt.err (!%p1061_p2)
}
 0x38e   : > { %809 = dma.vmem_to_hbm [thread:$0]  (%p1531_p1), %s1447_s1, 128, %s1445_s27, %s551_s9  }
 0x38f PF: > { %s1532_s28 = sld [smem:[#allocation20_spill]]  ;;  %s596_s10 = sand.u32 1, %s1111_s18  }
 0x390   : > { %p1533_p3 = scmp.ne.s32.totalorder %s1519_s8, 0  ;;  %s597_s12 = scalar_lea.sflag [#allocation4], %s596_s10 }
 0x395   : > { %p1534_p13 = scmp.ge.s32.totalorder %s1532_s28, 2 }
 0x397   : > { %p827_p11 = pnand %p1534_p13, %p1533_p3 }
 0x399   : > { %1102 = dma.done.wait (!%p827_p11), %s597_s12, 128  }
 0x39a   : > { %1104 = vsyncadd (!%p827_p11), %s597_s12, 4294967168  ;;  %s606_s7 = scalar_lea.sflag [#allocation12], %s596_s10 }
 0x39b   : > { %1106 = dma.done.wait (!%p827_p11), %s606_s7, 128  }
 0x39c   : > { %1108 = vsyncadd (!%p827_p11), %s606_s7, 4294967168  ;;  %s31_s23 = sadd.s32 1, %s1532_s28   ;;  %s1535_s6 = sld [smem:[#allocation18_spill]] }
 0x39d   : > { %p28_p10 = scmp.ge.s32.totalorder %s31_s23, 4   ;;  %s1536_s20 = sld [smem:[#allocation22_spill]] }
 0x39e   : > { %s1537_s21 = sld [smem:[#allocation19_spill]]  ;;  %s1538_s22 = sld [smem:[#allocation21_spill]] }
 0x39f   : > { %s1539_s18 = smov %s1115_s19  ;;  %30 = sbr.rel (!%p28_p10) target bundleno = 14 (0xe), region = 135 }
 0x3a2   : > { %s1540_s19 = smov %s1535_s6 }
 0x3a6   :  { %611 = vsyncpa [#allocation3], 1 }
 0x3a7   :  { %613 = vsyncpa [#allocation3 + $0x1], 1 }
 0x3a8   :  { %614 = vsyncpa [#allocation6], 1 }
 0x3a9   :  { %616 = vsyncpa [#allocation6 + $0x1], 1 }
 0x3aa   :  { %617 = vsyncpa [#allocation9], 1 }
 0x3ab   :  { %619 = vsyncpa [#allocation9 + $0x1], 1 }
 0x3ac   :  { %620 = vsyncpa [#allocation4], 1 }
 0x3ad   :  { %622 = vsyncpa [#allocation4 + $0x1], 1 }
 0x3ae   :  { %623 = vsyncpa [#allocation12], 1 }
 0x3af   :  { %625 = vsyncpa [#allocation12 + $0x1], 1 }

</bundles_post_ra>
